<compile_context>
chip_gen: v5e
topology: v5e:2x2
jax: 0.10.0
libtpu: 0.0.40
codegen_flags: <defaults>
</compile_context>

<pallas_src>
import functools
import math

import jax
import jax.numpy as jnp
from jax.experimental import pallas as pl
from jax.experimental.pallas import tpu as pltpu


def _round_up(x, m):
    return ((x + m - 1) // m) * m


def _divisor_tile(total, max_tile):
    """Largest multiple of 128 that divides `total` (a 128-multiple), <= max_tile."""
    best = 128
    t = 128
    cap = min(total, max_tile)
    while t <= cap:
        if total % t == 0:
            best = t
        t += 128
    return best


def _pad_to(a, shape):
    if tuple(a.shape) == tuple(shape):
        return a
    pads = [(0, t - s) for s, t in zip(a.shape, shape)]
    return jnp.pad(a, pads)


# --------------------- phase 1: support = x @ weight -------------------------

def _support_kernel(x_ref, w_ref, s_ref):
    # x_ref: (TM, F_in_pad), w_ref: (F_in_pad, TF), s_ref: (TM, TF) f32
    s_ref[...] = jnp.dot(
        x_ref[...], w_ref[...], preferred_element_type=jnp.float32
    ).astype(s_ref.dtype)


# ------------------ phase 2: out = adj @ support (+ bias) --------------------

def _make_aggregate_kernel(has_bias, use_scratch, support_cast_dtype):
    """out[b,i,j] = sum_k adj[b,i,k] @ support[b,k,j] (+ bias[j]).

    Refs arrive as: adj, support, [bias], out, [acc scratch].
    k == program_id(3) is the innermost reduction axis; the output block is
    resident across k, so we accumulate directly into it when it is f32.
    """
    def kernel(*refs):
        adj_ref, s_ref = refs[0], refs[1]
        idx = 2
        b_ref = None
        if has_bias:
            b_ref = refs[idx]
            idx += 1
        o_ref = refs[idx]
        idx += 1
        acc_ref = refs[idx] if use_scratch else o_ref

        k = pl.program_id(3)

        @pl.when(k == 0)
        def _():
            if has_bias:
                # Fold bias into the init instead of an extra add at the end.
                acc_ref[...] = (jnp.zeros(acc_ref.shape, jnp.float32)
                                + b_ref[...].astype(jnp.float32))
            else:
                acc_ref[...] = jnp.zeros_like(acc_ref)

        s = s_ref[...]
        if support_cast_dtype is not None:
            # bf16 x bf16 on the MXU with f32 accumulation.
            s = s.astype(support_cast_dtype)
        acc_ref[...] += jnp.dot(
            adj_ref[...], s, preferred_element_type=jnp.float32
        )

        if use_scratch:
            @pl.when(k == pl.num_programs(3) - 1)
            def _():
                o_ref[...] = acc_ref[...].astype(o_ref.dtype)

    return kernel


# ------------------------------- wrapper --------------------------------------

def graph_convolution(x, adj, weight, bias=None, *,
                      adj_compute_dtype=jnp.bfloat16,
                      max_row_tile=1024, max_k_tile=512, max_f_tile=512):
    """GCN layer forward: adj @ (x @ weight) [+ bias].

    x:      [B, N, F_in]
    adj:    [B, N, N]
    weight: [F_in, F_out]
    bias:   [1, 1, F_out] or None
    adj_compute_dtype: dtype in which adj is streamed / fed to the MXU
        (default bf16 -> halves the dominant HBM traffic; support/x/W stay
        f32 and accumulation is f32).  None = keep adj's own dtype (exact).
    returns [B, N, F_out] in x.dtype.
    """
    B, N, F_in = x.shape
    assert adj.shape == (B, N, N)
    assert weight.shape[0] == F_in
    F_out = weight.shape[1]

    out_dtype = jnp.dtype(x.dtype)
    adj_cdt = (jnp.dtype(adj.dtype) if adj_compute_dtype is None
               else jnp.dtype(adj_compute_dtype))

    # ---- geometry: pad only to 128-alignment; tiles are divisors of that ----
    N_pad = _round_up(N, 128)
    F_in_pad = _round_up(F_in, 128)
    F_out_pad = _round_up(F_out, 128)

    TK = _divisor_tile(N_pad, max_k_tile)       # contraction tile over nodes
    TF = _divisor_tile(F_out_pad, max_f_tile)   # output-feature tile
    TM = _divisor_tile(N_pad, max_row_tile)     # output-row tile over nodes
    # v7x megacore: make sure >= 2 parallel blocks exist so both TensorCores
    # get work (harmless on single-TC v5e/v6e).
    if B * (N_pad // TM) * (F_out_pad // TF) < 2 and N_pad >= 256:
        TM = _divisor_tile(N_pad, N_pad // 2)

    num_i = N_pad // TM
    num_k = N_pad // TK
    num_j = F_out_pad // TF

    # Zero padding is exact for both matmuls.  When dims are already aligned
    # and adj already has adj_cdt dtype these are no-ops; otherwise the pad and
    # astype of adj fuse into a single XLA pass under jit.
    x_p = _pad_to(x, (B, N_pad, F_in_pad))
    w_p = _pad_to(weight, (F_in_pad, F_out_pad))
    adj_p = _pad_to(adj, (B, N_pad, N_pad)).astype(adj_cdt)

    x_it = jnp.dtype(x_p.dtype).itemsize
    w_it = jnp.dtype(w_p.dtype).itemsize
    adj_it = jnp.dtype(adj_cdt).itemsize
    sup_it = 4                                   # support kept in f32
    out_it = jnp.dtype(out_dtype).itemsize

    use_scratch = out_dtype != jnp.float32       # else accumulate into o_ref
    support_cast = adj_cdt if adj_cdt != jnp.float32 else None

    # VMEM budget derived from the actual (double-buffered) block footprint
    # instead of a flat large request (v7x has only 64 MiB per TensorCore).
    vmem_p1 = 2 * (TM * F_in_pad * x_it + F_in_pad * TF * w_it + TM * TF * sup_it)
    vmem_p2 = 2 * (TM * TK * adj_it + TK * TF * sup_it + TM * TF * out_it)
    if bias is not None:
        vmem_p2 += 2 * TF * jnp.dtype(bias.dtype).itemsize
    if use_scratch:
        vmem_p2 += TM * TF * 4
    vmem_limit = int(min(64 * 1024 * 1024,
                         max(16 * 1024 * 1024,
                             (3 * max(vmem_p1, vmem_p2)) // 2 + (4 << 20))))

    # ---- phase 1: support = x @ W (stored f32) ------------------------------
    support = pl.pallas_call(
        _support_kernel,
        out_shape=jax.ShapeDtypeStruct((B, N_pad, F_out_pad), jnp.float32),
        grid_spec=pltpu.PrefetchScalarGridSpec(
            num_scalar_prefetch=0,
            grid=(B, num_i, num_j),
            in_specs=[
                pl.BlockSpec((None, TM, F_in_pad), lambda b, i, j: (b, i, 0)),
                pl.BlockSpec((F_in_pad, TF), lambda b, i, j: (0, j)),
            ],
            out_specs=pl.BlockSpec((None, TM, TF), lambda b, i, j: (b, i, j)),
        ),
        compiler_params=pltpu.CompilerParams(
            dimension_semantics=("parallel", "parallel", "parallel"),
            vmem_limit_bytes=vmem_limit,
        ),
        cost_estimate=pl.CostEstimate(
            flops=2 * B * N_pad * F_in_pad * F_out_pad,
            transcendentals=0,
            bytes_accessed=(B * num_j * N_pad * F_in_pad * x_it
                            + B * num_i * F_in_pad * F_out_pad * w_it
                            + B * N_pad * F_out_pad * sup_it),
        ),
    )(x_p, w_p)

    # ---- phase 2: out = adj @ support (+ bias) -------------------------------
    in_specs = [
        pl.BlockSpec((None, TM, TK), lambda b, i, j, k: (b, i, k)),
        pl.BlockSpec((None, TK, TF), lambda b, i, j, k: (b, k, j)),
    ]
    args = [adj_p, support]
    has_bias = bias is not None
    if has_bias:
        bias_p = _pad_to(jnp.reshape(bias, (1, F_out)), (1, F_out_pad))
        in_specs.append(pl.BlockSpec((1, TF), lambda b, i, j, k: (0, j)))
        args.append(bias_p)

    scratch_shapes = []
    if use_scratch:
        scratch_shapes.append(pltpu.VMEM((TM, TF), jnp.float32))

    kernel = _make_aggregate_kernel(has_bias, use_scratch, support_cast)

    out_p = pl.pallas_call(
        kernel,
        out_shape=jax.ShapeDtypeStruct((B, N_pad, F_out_pad), out_dtype),
        grid_spec=pltpu.PrefetchScalarGridSpec(
            num_scalar_prefetch=0,
            grid=(B, num_i, num_j, num_k),
            in_specs=in_specs,
            out_specs=pl.BlockSpec((None, TM, TF),
                                   lambda b, i, j, k: (b, i, j)),
            scratch_shapes=scratch_shapes,
        ),
        compiler_params=pltpu.CompilerParams(
            dimension_semantics=("parallel", "parallel", "parallel",
                                 "arbitrary"),
            vmem_limit_bytes=vmem_limit,
        ),
        cost_estimate=pl.CostEstimate(
            flops=2 * B * N_pad * N_pad * F_out_pad,
            transcendentals=0,
            bytes_accessed=(B * num_j * N_pad * N_pad * adj_it
                            + B * num_i * N_pad * F_out_pad * sup_it
                            + B * N_pad * F_out_pad * out_it),
        ),
    )(*args)

    return out_p[:, :N, :F_out]


def init_params(key, in_features, out_features, use_bias=False,
                dtype=jnp.float32):
    """Deterministic init matching reset_parameters(): U(-stdv, stdv)."""
    stdv = 1.0 / math.sqrt(out_features)
    k_w, k_b = jax.random.split(key)
    weight = jax.random.uniform(
        k_w, (in_features, out_features), dtype=dtype, minval=-stdv, maxval=stdv
    )
    bias = None
    if use_bias:
        bias = jax.random.uniform(
            k_b, (1, 1, out_features), dtype=dtype, minval=-stdv, maxval=stdv
        )
    return weight, bias


if __name__ == "__main__":
    # Small deterministic example: B=2 graphs, N=8 nodes, 16 -> 32 features.
    B, N, F_IN, F_OUT = 2, 8, 16, 32
    key = jax.random.PRNGKey(0)
    k_x, k_adj, k_p = jax.random.split(key, 3)

    x = jax.random.normal(k_x, (B, N, F_IN), dtype=jnp.float32)
    adj = jax.random.uniform(k_adj, (B, N, N), dtype=jnp.float32)

    # Exercise both the bias and no-bias branches (module default is bias=False).
    weight, bias = init_params(k_p, F_IN, F_OUT, use_bias=True)

    fwd_exact = jax.jit(functools.partial(graph_convolution,
                                          adj_compute_dtype=None))
    fwd_fast = jax.jit(graph_convolution)   # default: adj streamed in bf16

    ref_b = jnp.matmul(adj, jnp.matmul(x, weight)) + bias
    ref_nb = jnp.matmul(adj, jnp.matmul(x, weight))

    # Exact f32 path (bit-faithful module semantics), with and without bias.
    out = jax.block_until_ready(fwd_exact(x, adj, weight, bias))
    assert out.shape == (B, N, F_OUT)
    assert jnp.allclose(out, ref_b, atol=1e-5, rtol=1e-5)

    out_nb = jax.block_until_ready(fwd_exact(x, adj, weight, None))
    assert jnp.allclose(out_nb, ref_nb, atol=1e-5, rtol=1e-5)

    # Default fast path: adj in bf16 (halves the dominant HBM stream), support
    # and accumulation stay f32.
    out_fast = jax.block_until_ready(fwd_fast(x, adj, weight, bias))
    assert out_fast.shape == (B, N, F_OUT)
    assert jnp.allclose(out_fast, ref_b, atol=5e-2, rtol=5e-2)

    out_fast_nb = jax.block_until_ready(fwd_fast(x, adj, weight, None))
    assert jnp.allclose(out_fast_nb, ref_nb, atol=5e-2, rtol=5e-2)

    print("KERNEL_OK")
</pallas_src>

<mosaic_0001>
module attributes {stable_mosaic.version = 11 : i64} {
  func.func @_support_kernel(%arg0: i32, %arg1: i32, %arg2: i32, %arg3: memref<1x128x128xf32, #tpu.memory_space<vmem>>, %arg4: memref<128x128xf32, #tpu.memory_space<vmem>>, %arg5: memref<1x128x128xf32, #tpu.memory_space<vmem>>) attributes {dimension_semantics = [#tpu.dimension_semantics<parallel>, #tpu.dimension_semantics<parallel>, #tpu.dimension_semantics<parallel>], iteration_bounds = array<i64: 2, 1, 1>, scalar_prefetch = 0 : i64, scratch_operands = 0 : i64, tpu.core_type = #tpu.core_type<tc>, window_params = [{transform_indices = @transform_0, window_bounds = array<i64: 1, 128, 128>}, {transform_indices = @transform_1, window_bounds = array<i64: 128, 128>}, {transform_indices = @transform_2, window_bounds = array<i64: 1, 128, 128>}]} {
    %c0 = arith.constant 0 : index
    %c0_0 = arith.constant 0 : index
    %c0_1 = arith.constant 0 : index
    %0 = vector.load %arg3[%c0, %c0_0, %c0_1] : memref<1x128x128xf32, #tpu.memory_space<vmem>>, vector<1x128x128xf32>
    %1 = vector.shape_cast %0 : vector<1x128x128xf32> to vector<128x128xf32>
    %c0_2 = arith.constant 0 : index
    %c0_3 = arith.constant 0 : index
    %2 = vector.load %arg4[%c0_2, %c0_3] : memref<128x128xf32, #tpu.memory_space<vmem>>, vector<128x128xf32>
    %cst = arith.constant dense<0.000000e+00> : vector<128x128xf32>
    %3 = tpu.matmul %1, %2, %cst {dimension_numbers = #tpu.dot_dimension_numbers<[1], [0], [0], [1], [0, 0, 1, 1], [], []>} : vector<128x128xf32>, vector<128x128xf32>, vector<128x128xf32> -> vector<128x128xf32>
    %c0_4 = arith.constant 0 : index
    %c0_5 = arith.constant 0 : index
    %c0_6 = arith.constant 0 : index
    %4 = vector.load %arg5[%c0_4, %c0_5, %c0_6] : memref<1x128x128xf32, #tpu.memory_space<vmem>>, vector<1x128x128xf32>
    %5 = vector.shape_cast %4 : vector<1x128x128xf32> to vector<128x128xf32>
    %6 = vector.shape_cast %3 : vector<128x128xf32> to vector<1x128x128xf32>
    tpu.vector_store %arg5[%c0_4, %c0_5, %c0_6], %6 {strides = array<i32>} : memref<1x128x128xf32, #tpu.memory_space<vmem>>, vector<1x128x128xf32>,
    return
  }
  func.func @transform_0(%arg0: i32, %arg1: i32, %arg2: i32) -> (i32, i32, i32) {
    %c0_i32 = arith.constant 0 : i32
    %c0_i32_0 = arith.constant 0 : i32
    return %arg0, %arg1, %c0_i32 : i32, i32, i32
  }
  func.func @transform_1(%arg0: i32, %arg1: i32, %arg2: i32) -> (i32, i32) {
    %c0_i32 = arith.constant 0 : i32
    %c0_i32_0 = arith.constant 0 : i32
    return %c0_i32, %arg2 : i32, i32
  }
  func.func @transform_2(%arg0: i32, %arg1: i32, %arg2: i32) -> (i32, i32, i32) {
    %c0_i32 = arith.constant 0 : i32
    return %arg0, %arg1, %arg2 : i32, i32, i32
  }
}

module attributes {stable_mosaic.version = 11 : i64} {
  func.func @kernel(%arg0: i32, %arg1: i32, %arg2: i32, %arg3: i32, %arg4: memref<1x128x128xf32, #tpu.memory_space<vmem>>, %arg5: memref<1x128x128xf32, #tpu.memory_space<vmem>>, %arg6: memref<1x128xf32, #tpu.memory_space<vmem>>, %arg7: memref<1x128x128xf32, #tpu.memory_space<vmem>>) attributes {dimension_semantics = [#tpu.dimension_semantics<parallel>, #tpu.dimension_semantics<parallel>, #tpu.dimension_semantics<parallel>, #tpu.dimension_semantics<arbitrary>], iteration_bounds = array<i64: 2, 1, 1, 1>, scalar_prefetch = 0 : i64, scratch_operands = 0 : i64, tpu.core_type = #tpu.core_type<tc>, window_params = [{transform_indices = @transform_0, window_bounds = array<i64: 1, 128, 128>}, {transform_indices = @transform_1, window_bounds = array<i64: 1, 128, 128>}, {transform_indices = @transform_2, window_bounds = array<i64: 1, 128>}, {transform_indices = @transform_3, window_bounds = array<i64: 1, 128, 128>}]} {
    %c0_i32 = arith.constant 0 : i32
    %0 = arith.cmpi eq, %arg3, %c0_i32 : i32
    %1 = arith.extui %0 : i1 to i32
    %c0_i32_0 = arith.constant 0 : i32
    %2 = arith.cmpi ne, %1, %c0_i32_0 : i32
    scf.if %2 {
      %cst_12 = arith.constant 0.000000e+00 : f32
      %14 = vector.broadcast %cst_12 : f32 to vector<128x128xf32>
      %c0_13 = arith.constant 0 : index
      %c0_14 = arith.constant 0 : index
      %15 = vector.load %arg6[%c0_13, %c0_14] : memref<1x128xf32, #tpu.memory_space<vmem>>, vector<1x128xf32>
      %16 = vector.broadcast %15 : vector<1x128xf32> to vector<128x128xf32>
      %17 = arith.addf %14, %16 : vector<128x128xf32>
      %c0_15 = arith.constant 0 : index
      %c0_16 = arith.constant 0 : index
      %c0_17 = arith.constant 0 : index
      %18 = vector.load %arg7[%c0_15, %c0_16, %c0_17] : memref<1x128x128xf32, #tpu.memory_space<vmem>>, vector<1x128x128xf32>
      %19 = vector.shape_cast %18 : vector<1x128x128xf32> to vector<128x128xf32>
      %20 = vector.shape_cast %17 : vector<128x128xf32> to vector<1x128x128xf32>
      tpu.vector_store %arg7[%c0_15, %c0_16, %c0_17], %20 {strides = array<i32>} : memref<1x128x128xf32, #tpu.memory_space<vmem>>, vector<1x128x128xf32>,
    } else {
    }
    %c0 = arith.constant 0 : index
    %c0_1 = arith.constant 0 : index
    %c0_2 = arith.constant 0 : index
    %3 = vector.load %arg5[%c0, %c0_1, %c0_2] : memref<1x128x128xf32, #tpu.memory_space<vmem>>, vector<1x128x128xf32>
    %4 = vector.shape_cast %3 : vector<1x128x128xf32> to vector<128x128xf32>
    %c0_3 = arith.constant 0 : index
    %c0_4 = arith.constant 0 : index
    %c0_5 = arith.constant 0 : index
    %5 = vector.load %arg7[%c0_3, %c0_4, %c0_5] : memref<1x128x128xf32, #tpu.memory_space<vmem>>, vector<1x128x128xf32>
    %6 = vector.shape_cast %5 : vector<1x128x128xf32> to vector<128x128xf32>
    %c0_6 = arith.constant 0 : index
    %c0_7 = arith.constant 0 : index
    %c0_8 = arith.constant 0 : index
    %7 = vector.load %arg4[%c0_6, %c0_7, %c0_8] : memref<1x128x128xf32, #tpu.memory_space<vmem>>, vector<1x128x128xf32>
    %8 = vector.shape_cast %7 : vector<1x128x128xf32> to vector<128x128xf32>
    %cst = arith.constant dense<0.000000e+00> : vector<128x128xf32>
    %9 = tpu.matmul %8, %4, %cst {dimension_numbers = #tpu.dot_dimension_numbers<[1], [0], [0], [1], [0, 0, 1, 1], [], []>} : vector<128x128xf32>, vector<128x128xf32>, vector<128x128xf32> -> vector<128x128xf32>
    %10 = arith.addf %6, %9 : vector<128x128xf32>
    %c0_9 = arith.constant 0 : index
    %c0_10 = arith.constant 0 : index
    %c0_11 = arith.constant 0 : index
    %11 = vector.load %arg7[%c0_9, %c0_10, %c0_11] : memref<1x128x128xf32, #tpu.memory_space<vmem>>, vector<1x128x128xf32>
    %12 = vector.shape_cast %11 : vector<1x128x128xf32> to vector<128x128xf32>
    %13 = vector.shape_cast %10 : vector<128x128xf32> to vector<1x128x128xf32>
    tpu.vector_store %arg7[%c0_9, %c0_10, %c0_11], %13 {strides = array<i32>} : memref<1x128x128xf32, #tpu.memory_space<vmem>>, vector<1x128x128xf32>,
    return
  }
  func.func @transform_0(%arg0: i32, %arg1: i32, %arg2: i32, %arg3: i32) -> (i32, i32, i32) {
    %c0_i32 = arith.constant 0 : i32
    return %arg0, %arg1, %arg3 : i32, i32, i32
  }
  func.func @transform_1(%arg0: i32, %arg1: i32, %arg2: i32, %arg3: i32) -> (i32, i32, i32) {
    %c0_i32 = arith.constant 0 : i32
    return %arg0, %arg3, %arg2 : i32, i32, i32
  }
  func.func @transform_2(%arg0: i32, %arg1: i32, %arg2: i32, %arg3: i32) -> (i32, i32) {
    %c0_i32 = arith.constant 0 : i32
    %c0_i32_0 = arith.constant 0 : i32
    return %c0_i32, %arg2 : i32, i32
  }
  func.func @transform_3(%arg0: i32, %arg1: i32, %arg2: i32, %arg3: i32) -> (i32, i32, i32) {
    %c0_i32 = arith.constant 0 : i32
    return %arg0, %arg1, %arg2 : i32, i32, i32
  }
}

</mosaic_0001>

<bundles_post_ra>
// kernel: graph_convolution.2
= control target key start
LH: loop header
LB: loop body
LE: loop exit
PB: predicated region body
PF: predicated region fallthrough
CT: control target
= control target key end

     0   :  { %s568_s9 = smov 0   ;;  %s570_s10 = smov 0   ;;  %s696_s0 = inlined_call_operand.vmem [shape: f32[2,128,128], index: 0, kind: input, shape index: {}]   ;;  %s697_s1 = inlined_call_operand.vmem [shape: f32[128,128], index: 1, kind: input, shape index: {}]   ;;  %s698_s2 = inlined_call_operand.vmem [shape: f32[2,128,128], index: 2, kind: output, shape index: {}]  }
   0x1   :  { %s572_s11 = smov 0  }
   0x2 LB: > { %s31_s12 = sadd.s32 1, %s547_s10  ;;  %p448_p0 = scmp.ge.s32.totalorder %s551_s11, 1  ;;  %s551_s11 = sphi %s572_s11, %s12_s11   ;;  %s547_s10 = sphi %s570_s10, %s700_s10   ;;  %s543_s9 = sphi %s568_s9, %s699_s9  }
   0x3   : > { %p33_p1 = scmp.ge.s32.totalorder %s31_s12, 2  ;;  %p151_p2 = scmp.lt.s32.totalorder %s551_s11, 3 }
   0x5   : > { %s702_s12 = smov (%p33_p1, %s31_s12), 0  ;;  %p152_p3 = pnand %p448_p0, %p151_p2 }
   0x6   : > { %p189_p4 = scmp.lt.s32.totalorder (!%p152_p3), %s543_s9, 1 }
   0x7   : > { %155 = sbr.rel (%p152_p3) target bundleno = 202 (0xca), region = 28 }
   0xc   : > { %v246_v0 = vld [vmem:[%s697_s1 + $0x78] sm:$0xff]  ;;  %v245_v1 = vld [vmem:[%s697_s1 + $0x70] sm:$0xff]  ;;  %v244_v2 = vld [vmem:[%s697_s1 + $0x68] sm:$0xff]  ;;  %s704_s9 = smov (!%p189_p4, %s543_s9), 1 }
   0xd   : > { %458 = vmatpush.msra.mxu2 %v246_v0  ;;  %459 = vmatpush.msra.mxu3 %v246_v0  ;;  %v243_v3 = vld [vmem:[%s697_s1 + $0x60] sm:$0xff]  ;;  %v242_v4 = vld [vmem:[%s697_s1 + $0x58] sm:$0xff]  ;;  %v241_v5 = vld [vmem:[%s697_s1 + $0x50] sm:$0xff]  ;;  %s455_s15 = sshll.u32 %s704_s9, 7 }
   0xe   : > { %247 = vmatpush.msra.mxu0 %v246_v0  ;;  %457 = vmatpush.msra.mxu1 %v246_v0  ;;  %v240_v6 = vld [vmem:[%s697_s1 + $0x48] sm:$0xff]  ;;  %v239_v7 = vld [vmem:[%s697_s1 + $0x40] sm:$0xff]  ;;  %v238_v8 = vld [vmem:[%s697_s1 + $0x38] sm:$0xff]  ;;  %s643_s22 = scalar_lea.vmem %s696_s0, %s455_s15  ;;  %s669_s27 = scalar_lea.vmem %s698_s2, %s455_s15 }
   0xf   : > { %461 = vmatpush.msra.mxu2 %v245_v1  ;;  %462 = vmatpush.msra.mxu3 %v245_v1  ;;  %v237_v9 = vld [vmem:[%s697_s1 + $0x30] sm:$0xff]  ;;  %v236_v10 = vld [vmem:[%s697_s1 + $0x28] sm:$0xff]  ;;  %v235_v11 = vld [vmem:[%s697_s1 + $0x20] sm:$0xff] }
  0x10   : > { %248 = vmatpush.msra.mxu0 %v245_v1  ;;  %460 = vmatpush.msra.mxu1 %v245_v1  ;;  %v234_v12 = vld [vmem:[%s697_s1 + $0x18] sm:$0xff]  ;;  %v233_v13 = vld [vmem:[%s697_s1 + $0x10] sm:$0xff]  ;;  %v232_v14 = vld [vmem:[%s697_s1 + $0x8] sm:$0xff] }
  0x11   : > { %464 = vmatpush.msra.mxu2 %v244_v2  ;;  %465 = vmatpush.msra.mxu3 %v244_v2  ;;  %v231_v15 = vld [vmem:[%s697_s1] sm:$0xff]  ;;  %v224_v20 = vld [vmem:[%s643_s22 + $0x48] sm:$0xff]  ;;  %v225_v24 = vld [vmem:[%s643_s22 + $0x50] sm:$0xff] }
  0x12   : > { %249 = vmatpush.msra.mxu0 %v244_v2  ;;  %463 = vmatpush.msra.mxu1 %v244_v2  ;;  %v223_v16 = vld [vmem:[%s643_s22 + $0x40] sm:$0xff]  ;;  %v228_v21 = vld [vmem:[%s643_s22 + $0x68] sm:$0xff]  ;;  %v229_v25 = vld [vmem:[%s643_s22 + $0x70] sm:$0xff] }
  0x13   : > { %467 = vmatpush.msra.mxu2 %v243_v3  ;;  %468 = vmatpush.msra.mxu3 %v243_v3  ;;  %v227_v17 = vld [vmem:[%s643_s22 + $0x60] sm:$0xff]  ;;  %v216_v22 = vld [vmem:[%s643_s22 + $0x8] sm:$0xff]  ;;  %v217_v26 = vld [vmem:[%s643_s22 + $0x10] sm:$0xff] }
  0x14   : > { %250 = vmatpush.msra.mxu0 %v243_v3  ;;  %466 = vmatpush.msra.mxu1 %v243_v3  ;;  %v215_v18 = vld [vmem:[%s643_s22] sm:$0xff]  ;;  %v220_v23 = vld [vmem:[%s643_s22 + $0x28] sm:$0xff]  ;;  %v221_v27 = vld [vmem:[%s643_s22 + $0x30] sm:$0xff] }
  0x15   : > { %470 = vmatpush.msra.mxu2 %v242_v4  ;;  %471 = vmatpush.msra.mxu3 %v242_v4  ;;  %v219_v19 = vld [vmem:[%s643_s22 + $0x20] sm:$0xff]  ;;  %v226_v28 = vld [vmem:[%s643_s22 + $0x58] sm:$0xff] }
  0x16   : > { %251 = vmatpush.msra.mxu0 %v242_v4  ;;  %469 = vmatpush.msra.mxu1 %v242_v4  ;;  %v230_v29 = vld [vmem:[%s643_s22 + $0x78] sm:$0xff] }
  0x17   : > { %473 = vmatpush.msra.mxu2 %v241_v5  ;;  %474 = vmatpush.msra.mxu3 %v241_v5  ;;  %v218_v30 = vld [vmem:[%s643_s22 + $0x18] sm:$0xff] }
  0x18   : > { %252 = vmatpush.msra.mxu0 %v241_v5  ;;  %472 = vmatpush.msra.mxu1 %v241_v5  ;;  %v222_v31 = vld [vmem:[%s643_s22 + $0x38] sm:$0xff] }
  0x19   : > { %476 = vmatpush.msra.mxu2 %v240_v6  ;;  %477 = vmatpush.msra.mxu3 %v240_v6 }
  0x1a   : > { %253 = vmatpush.msra.mxu0 %v240_v6  ;;  %475 = vmatpush.msra.mxu1 %v240_v6 }
  0x1b   : > { %479 = vmatpush.msra.mxu2 %v239_v7  ;;  %480 = vmatpush.msra.mxu3 %v239_v7 }
  0x1c   : > { %254 = vmatpush.msra.mxu0 %v239_v7  ;;  %478 = vmatpush.msra.mxu1 %v239_v7 }
  0x1d   : > { %482 = vmatpush.msra.mxu2 %v238_v8  ;;  %483 = vmatpush.msra.mxu3 %v238_v8 }
  0x1e   : > { %255 = vmatpush.msra.mxu0 %v238_v8  ;;  %481 = vmatpush.msra.mxu1 %v238_v8 }
  0x1f   : > { %485 = vmatpush.msra.mxu2 %v237_v9  ;;  %486 = vmatpush.msra.mxu3 %v237_v9 }
  0x20   : > { %256 = vmatpush.msra.mxu0 %v237_v9  ;;  %484 = vmatpush.msra.mxu1 %v237_v9 }
  0x21   : > { %488 = vmatpush.msra.mxu2 %v236_v10  ;;  %489 = vmatpush.msra.mxu3 %v236_v10 }
  0x22   : > { %257 = vmatpush.msra.mxu0 %v236_v10  ;;  %487 = vmatpush.msra.mxu1 %v236_v10 }
  0x23   : > { %491 = vmatpush.msra.mxu2 %v235_v11  ;;  %492 = vmatpush.msra.mxu3 %v235_v11 }
  0x24   : > { %258 = vmatpush.msra.mxu0 %v235_v11  ;;  %490 = vmatpush.msra.mxu1 %v235_v11 }
  0x25   : > { %494 = vmatpush.msra.mxu2 %v234_v12  ;;  %495 = vmatpush.msra.mxu3 %v234_v12 }
  0x26   : > { %259 = vmatpush.msra.mxu0 %v234_v12  ;;  %493 = vmatpush.msra.mxu1 %v234_v12 }
  0x27   : > { %497 = vmatpush.msra.mxu2 %v233_v13  ;;  %498 = vmatpush.msra.mxu3 %v233_v13 }
  0x28   : > { %260 = vmatpush.msra.mxu0 %v233_v13  ;;  %496 = vmatpush.msra.mxu1 %v233_v13 }
  0x29   : > { %500 = vmatpush.msra.mxu2 %v232_v14  ;;  %501 = vmatpush.msra.mxu3 %v232_v14 }
  0x2a   : > { %261 = vmatpush.msra.mxu0 %v232_v14  ;;  %499 = vmatpush.msra.mxu1 %v232_v14 }
  0x2b   : > { %503 = vmatpush.msra.mxu2 %v231_v15  ;;  %504 = vmatpush.msra.mxu3 %v231_v15 }
  0x2c   : > { %287 = vmatmul.f32.vlgmr.msra.gmra.mxu2 %v223_v16  ;;  %299 = vmatmul.f32.vlgmr.msra.gmra.mxu3 %v227_v17 }
  0x2d   : > { %262 = vmatpush.msra.mxu0 %v231_v15  ;;  %502 = vmatpush.msra.mxu1 %v231_v15 }
  0x2e   : > { %263 = vmatmul.f32.vlgmr.msra.gmra.mxu0 %v215_v18  ;;  %275 = vmatmul.f32.vlgmr.msra.gmra.mxu1 %v219_v19 }
  0x34   : > { %290 = vmatmul.f32.gmra.mxu2 %v224_v20  ;;  %302 = vmatmul.f32.gmra.mxu3 %v228_v21 }
  0x36   : > { %266 = vmatmul.f32.gmra.mxu0 %v216_v22  ;;  %278 = vmatmul.f32.gmra.mxu1 %v220_v23 }
  0x3c   : > { %293 = vmatmul.f32.gmra.mxu2 %v225_v24  ;;  %305 = vmatmul.f32.gmra.mxu3 %v229_v25 }
  0x3e   : > { %269 = vmatmul.f32.gmra.mxu0 %v217_v26  ;;  %281 = vmatmul.f32.gmra.mxu1 %v221_v27 }
  0x44   : > { %296 = vmatmul.f32.gmra.mxu2 %v226_v28  ;;  %308 = vmatmul.f32.gmra.mxu3 %v230_v29 }
  0x46   : > { %272 = vmatmul.f32.gmra.mxu0 %v218_v30  ;;  %284 = vmatmul.f32.gmra.mxu1 %v222_v31 }
  0xab   : > { %v264_v32 = vpop.f32.mrf.mxu0  ;;  %v276_v33 = vpop.f32.mrf.mxu1 }
  0xac   : > { %312 = vst [vmem:[%s669_s27] sm:$0xff] %v264_v32 }
  0xad   : > { %316 = vst [vmem:[%s669_s27 + $0x20] sm:$0xff] %v276_v33 }
  0xaf   : > { %v288_v34 = vpop.f32.mrf.mxu2  ;;  %v300_v35 = vpop.f32.mrf.mxu3 }
  0xb0   : > { %320 = vst [vmem:[%s669_s27 + $0x40] sm:$0xff] %v288_v34 }
  0xb1   : > { %324 = vst [vmem:[%s669_s27 + $0x60] sm:$0xff] %v300_v35 }
  0xb3   : > { %v267_v36 = vpop.f32.mrf.mxu0  ;;  %v279_v37 = vpop.f32.mrf.mxu1 }
  0xb4   : > { %313 = vst [vmem:[%s669_s27 + $0x8] sm:$0xff] %v267_v36 }
  0xb5   : > { %317 = vst [vmem:[%s669_s27 + $0x28] sm:$0xff] %v279_v37 }
  0xb7   : > { %v291_v38 = vpop.f32.mrf.mxu2  ;;  %v303_v39 = vpop.f32.mrf.mxu3 }
  0xb8   : > { %321 = vst [vmem:[%s669_s27 + $0x48] sm:$0xff] %v291_v38 }
  0xb9   : > { %325 = vst [vmem:[%s669_s27 + $0x68] sm:$0xff] %v303_v39 }
  0xbb   : > { %v270_v40 = vpop.f32.mrf.mxu0  ;;  %v282_v41 = vpop.f32.mrf.mxu1 }
  0xbc   : > { %314 = vst [vmem:[%s669_s27 + $0x10] sm:$0xff] %v270_v40 }
  0xbd   : > { %318 = vst [vmem:[%s669_s27 + $0x30] sm:$0xff] %v282_v41 }
  0xbf   : > { %v294_v42 = vpop.f32.mrf.mxu2  ;;  %v306_v43 = vpop.f32.mrf.mxu3 }
  0xc0   : > { %322 = vst [vmem:[%s669_s27 + $0x50] sm:$0xff] %v294_v42 }
  0xc1   : > { %326 = vst [vmem:[%s669_s27 + $0x70] sm:$0xff] %v306_v43 }
  0xc3   : > { %v273_v44 = vpop.f32.mrf.mxu0  ;;  %v285_v45 = vpop.f32.mrf.mxu1 }
  0xc4   : > { %315 = vst [vmem:[%s669_s27 + $0x18] sm:$0xff] %v273_v44 }
  0xc5   : > { %319 = vst [vmem:[%s669_s27 + $0x38] sm:$0xff] %v285_v45 }
  0xc7   : > { %v297_v46 = vpop.f32.mrf.mxu2  ;;  %v309_v47 = vpop.f32.mrf.mxu3 }
  0xc8   : > { %323 = vst [vmem:[%s669_s27 + $0x58] sm:$0xff] %v297_v46 }
  0xc9   : > { %327 = vst [vmem:[%s669_s27 + $0x78] sm:$0xff] %v309_v47 }
  0xca PF: > { %s12_s11 = sadd.s32 1, %s551_s11   ;;  %s699_s9 = smov %s547_s10 }
  0xcb   : > { %p9_p5 = scmp.ge.s32.totalorder %s12_s11, 4   ;;  %s700_s10 = smov %s702_s12 }
  0xcd   :  { %11 = sbr.rel (!%p9_p5) target bundleno = 2 (0x2), region = 61 }

// kernel: graph_convolution.3
= control target key start
LH: loop header
LB: loop body
LE: loop exit
PB: predicated region body
PF: predicated region fallthrough
CT: control target
= control target key end

     0   :  { %s747_s12 = smov 0   ;;  %s749_s13 = smov 0   ;;  %s845_s0 = inlined_call_operand.vmem [shape: f32[2,128,128], index: 0, kind: input, shape index: {}]   ;;  %s846_s1 = inlined_call_operand.vmem [shape: f32[2,128,128], index: 1, kind: input, shape index: {}]   ;;  %s847_s2 = inlined_call_operand.vmem [shape: f32[1,128], index: 2, kind: input, shape index: {}]   ;;  %s848_s3 = inlined_call_operand.vmem [shape: f32[2,128,128], index: 3, kind: output, shape index: {}]  }
   0x1   :  { %s751_s14 = smov 0  }
   0x2 LB: > { %s39_s15 = sadd.s32 1, %s721_s13  ;;  %p618_p0 = scmp.ge.s32.totalorder %s725_s14, 1  ;;  %s725_s14 = sphi %s751_s14, %s13_s14   ;;  %s721_s13 = sphi %s749_s13, %s850_s13   ;;  %s717_s12 = sphi %s747_s12, %s849_s12  }
   0x3   : > { %p41_p1 = scmp.ge.s32.totalorder %s39_s15, 2  ;;  %p209_p2 = scmp.lt.s32.totalorder %s725_s14, 3 }
   0x5   : > { %s852_s15 = smov (%p41_p1, %s39_s15), 0  ;;  %p210_p3 = pnand %p618_p0, %p209_p2 }
   0x6   : > { %p263_p4 = scmp.lt.s32.totalorder (!%p210_p3), %s717_s12, 1 }
   0x7   : > { %213 = sbr.rel (%p210_p3) target bundleno = 207 (0xcf), region = 32 }
   0xc   : > { %s854_s12 = smov (!%p263_p4, %s717_s12), 1  ;;  %v702_v32 = vld [vmem:[%s847_s2] ss:$0 sm:$0xff] }
   0xd   : > { %s765_s16 = sshll.u32 %s854_s12, 7 }
   0xe   : > { %s771_s19 = scalar_lea.vmem %s846_s1, %s765_s16  ;;  %s792_s22 = scalar_lea.vmem %s845_s0, %s765_s16 }
   0xf   : > { %v344_v0 = vld [vmem:[%s771_s19 + $0x78] sm:$0xff]  ;;  %v343_v1 = vld [vmem:[%s771_s19 + $0x70] sm:$0xff]  ;;  %v342_v2 = vld [vmem:[%s771_s19 + $0x68] sm:$0xff]  ;;  %s818_s27 = scalar_lea.vmem %s848_s3, %s765_s16 }
  0x10   : > { %631 = vmatpush.msra.mxu2 %v344_v0  ;;  %632 = vmatpush.msra.mxu3 %v344_v0  ;;  %v341_v3 = vld [vmem:[%s771_s19 + $0x60] sm:$0xff]  ;;  %v340_v4 = vld [vmem:[%s771_s19 + $0x58] sm:$0xff]  ;;  %v339_v5 = vld [vmem:[%s771_s19 + $0x50] sm:$0xff] }
  0x11   : > { %377 = vmatpush.msra.mxu0 %v344_v0  ;;  %630 = vmatpush.msra.mxu1 %v344_v0  ;;  %v338_v6 = vld [vmem:[%s771_s19 + $0x48] sm:$0xff]  ;;  %v337_v7 = vld [vmem:[%s771_s19 + $0x40] sm:$0xff]  ;;  %v336_v8 = vld [vmem:[%s771_s19 + $0x38] sm:$0xff] }
  0x12   : > { %634 = vmatpush.msra.mxu2 %v343_v1  ;;  %635 = vmatpush.msra.mxu3 %v343_v1  ;;  %v335_v9 = vld [vmem:[%s771_s19 + $0x30] sm:$0xff]  ;;  %v334_v10 = vld [vmem:[%s771_s19 + $0x28] sm:$0xff]  ;;  %v333_v11 = vld [vmem:[%s771_s19 + $0x20] sm:$0xff] }
  0x13   : > { %378 = vmatpush.msra.mxu0 %v343_v1  ;;  %633 = vmatpush.msra.mxu1 %v343_v1  ;;  %v332_v12 = vld [vmem:[%s771_s19 + $0x18] sm:$0xff]  ;;  %v331_v13 = vld [vmem:[%s771_s19 + $0x10] sm:$0xff]  ;;  %v330_v14 = vld [vmem:[%s771_s19 + $0x8] sm:$0xff] }
  0x14   : > { %637 = vmatpush.msra.mxu2 %v342_v2  ;;  %638 = vmatpush.msra.mxu3 %v342_v2  ;;  %v329_v15 = vld [vmem:[%s771_s19] sm:$0xff]  ;;  %v370_v20 = vld [vmem:[%s792_s22 + $0x48] sm:$0xff]  ;;  %v371_v24 = vld [vmem:[%s792_s22 + $0x50] sm:$0xff] }
  0x15   : > { %379 = vmatpush.msra.mxu0 %v342_v2  ;;  %636 = vmatpush.msra.mxu1 %v342_v2  ;;  %v369_v16 = vld [vmem:[%s792_s22 + $0x40] sm:$0xff]  ;;  %v374_v21 = vld [vmem:[%s792_s22 + $0x68] sm:$0xff]  ;;  %v375_v25 = vld [vmem:[%s792_s22 + $0x70] sm:$0xff] }
  0x16   : > { %640 = vmatpush.msra.mxu2 %v341_v3  ;;  %641 = vmatpush.msra.mxu3 %v341_v3  ;;  %v373_v17 = vld [vmem:[%s792_s22 + $0x60] sm:$0xff]  ;;  %v362_v22 = vld [vmem:[%s792_s22 + $0x8] sm:$0xff]  ;;  %v363_v26 = vld [vmem:[%s792_s22 + $0x10] sm:$0xff] }
  0x17   : > { %380 = vmatpush.msra.mxu0 %v341_v3  ;;  %639 = vmatpush.msra.mxu1 %v341_v3  ;;  %v361_v18 = vld [vmem:[%s792_s22] sm:$0xff]  ;;  %v366_v23 = vld [vmem:[%s792_s22 + $0x28] sm:$0xff]  ;;  %v367_v27 = vld [vmem:[%s792_s22 + $0x30] sm:$0xff] }
  0x18   : > { %643 = vmatpush.msra.mxu2 %v340_v4  ;;  %644 = vmatpush.msra.mxu3 %v340_v4  ;;  %v365_v19 = vld [vmem:[%s792_s22 + $0x20] sm:$0xff]  ;;  %v372_v28 = vld [vmem:[%s792_s22 + $0x58] sm:$0xff] }
  0x19   : > { %381 = vmatpush.msra.mxu0 %v340_v4  ;;  %642 = vmatpush.msra.mxu1 %v340_v4  ;;  %v376_v29 = vld [vmem:[%s792_s22 + $0x78] sm:$0xff] }
  0x1a   : > { %646 = vmatpush.msra.mxu2 %v339_v5  ;;  %647 = vmatpush.msra.mxu3 %v339_v5  ;;  %v364_v30 = vld [vmem:[%s792_s22 + $0x18] sm:$0xff] }
  0x1b   : > { %382 = vmatpush.msra.mxu0 %v339_v5  ;;  %645 = vmatpush.msra.mxu1 %v339_v5  ;;  %v368_v31 = vld [vmem:[%s792_s22 + $0x38] sm:$0xff] }
  0x1c   : > { %649 = vmatpush.msra.mxu2 %v338_v6  ;;  %650 = vmatpush.msra.mxu3 %v338_v6 }
  0x1d   : > { %383 = vmatpush.msra.mxu0 %v338_v6  ;;  %648 = vmatpush.msra.mxu1 %v338_v6 }
  0x1e   : > { %652 = vmatpush.msra.mxu2 %v337_v7  ;;  %653 = vmatpush.msra.mxu3 %v337_v7 }
  0x1f   : > { %384 = vmatpush.msra.mxu0 %v337_v7  ;;  %651 = vmatpush.msra.mxu1 %v337_v7 }
  0x20   : > { %655 = vmatpush.msra.mxu2 %v336_v8  ;;  %656 = vmatpush.msra.mxu3 %v336_v8 }
  0x21   : > { %385 = vmatpush.msra.mxu0 %v336_v8  ;;  %654 = vmatpush.msra.mxu1 %v336_v8 }
  0x22   : > { %658 = vmatpush.msra.mxu2 %v335_v9  ;;  %659 = vmatpush.msra.mxu3 %v335_v9 }
  0x23   : > { %386 = vmatpush.msra.mxu0 %v335_v9  ;;  %657 = vmatpush.msra.mxu1 %v335_v9 }
  0x24   : > { %661 = vmatpush.msra.mxu2 %v334_v10  ;;  %662 = vmatpush.msra.mxu3 %v334_v10 }
  0x25   : > { %387 = vmatpush.msra.mxu0 %v334_v10  ;;  %660 = vmatpush.msra.mxu1 %v334_v10 }
  0x26   : > { %664 = vmatpush.msra.mxu2 %v333_v11  ;;  %665 = vmatpush.msra.mxu3 %v333_v11 }
  0x27   : > { %388 = vmatpush.msra.mxu0 %v333_v11  ;;  %663 = vmatpush.msra.mxu1 %v333_v11 }
  0x28   : > { %667 = vmatpush.msra.mxu2 %v332_v12  ;;  %668 = vmatpush.msra.mxu3 %v332_v12 }
  0x29   : > { %389 = vmatpush.msra.mxu0 %v332_v12  ;;  %666 = vmatpush.msra.mxu1 %v332_v12 }
  0x2a   : > { %670 = vmatpush.msra.mxu2 %v331_v13  ;;  %671 = vmatpush.msra.mxu3 %v331_v13 }
  0x2b   : > { %390 = vmatpush.msra.mxu0 %v331_v13  ;;  %669 = vmatpush.msra.mxu1 %v331_v13 }
  0x2c   : > { %673 = vmatpush.msra.mxu2 %v330_v14  ;;  %674 = vmatpush.msra.mxu3 %v330_v14 }
  0x2d   : > { %391 = vmatpush.msra.mxu0 %v330_v14  ;;  %672 = vmatpush.msra.mxu1 %v330_v14 }
  0x2e   : > { %676 = vmatpush.msra.mxu2 %v329_v15  ;;  %677 = vmatpush.msra.mxu3 %v329_v15 }
  0x2f   : > { %417 = vmatmul.f32.vlgmr.msra.gmra.mxu2 %v369_v16  ;;  %429 = vmatmul.f32.vlgmr.msra.gmra.mxu3 %v373_v17 }
  0x30   : > { %392 = vmatpush.msra.mxu0 %v329_v15  ;;  %675 = vmatpush.msra.mxu1 %v329_v15 }
  0x31   : > { %393 = vmatmul.f32.vlgmr.msra.gmra.mxu0 %v361_v18  ;;  %405 = vmatmul.f32.vlgmr.msra.gmra.mxu1 %v365_v19 }
  0x37   : > { %420 = vmatmul.f32.gmra.mxu2 %v370_v20  ;;  %432 = vmatmul.f32.gmra.mxu3 %v374_v21 }
  0x39   : > { %396 = vmatmul.f32.gmra.mxu0 %v362_v22  ;;  %408 = vmatmul.f32.gmra.mxu1 %v366_v23 }
  0x3f   : > { %423 = vmatmul.f32.gmra.mxu2 %v371_v24  ;;  %435 = vmatmul.f32.gmra.mxu3 %v375_v25 }
  0x41   : > { %399 = vmatmul.f32.gmra.mxu0 %v363_v26  ;;  %411 = vmatmul.f32.gmra.mxu1 %v367_v27 }
  0x47   : > { %426 = vmatmul.f32.gmra.mxu2 %v372_v28  ;;  %438 = vmatmul.f32.gmra.mxu3 %v376_v29 }
  0x49   : > { %402 = vmatmul.f32.gmra.mxu0 %v364_v30  ;;  %414 = vmatmul.f32.gmra.mxu1 %v368_v31 }
  0xae   : > { %v394_v33 = vpop.f32.mrf.mxu0  ;;  %v406_v34 = vpop.f32.mrf.mxu1 }
  0xaf   : > { %v442_v35 = vadd.f32 %v702_v32, %v394_v33  ;;  %v446_v36 = vadd.f32 %v702_v32, %v406_v34 }
  0xb1   : > { %458 = vst [vmem:[%s818_s27] sm:$0xff] %v442_v35 }
  0xb2   : > { %462 = vst [vmem:[%s818_s27 + $0x20] sm:$0xff] %v446_v36  ;;  %v418_v37 = vpop.f32.mrf.mxu2  ;;  %v430_v38 = vpop.f32.mrf.mxu3 }
  0xb3   : > { %v450_v39 = vadd.f32 %v702_v32, %v418_v37  ;;  %v454_v40 = vadd.f32 %v702_v32, %v430_v38 }
  0xb5   : > { %466 = vst [vmem:[%s818_s27 + $0x40] sm:$0xff] %v450_v39 }
  0xb6   : > { %470 = vst [vmem:[%s818_s27 + $0x60] sm:$0xff] %v454_v40  ;;  %v397_v41 = vpop.f32.mrf.mxu0  ;;  %v409_v42 = vpop.f32.mrf.mxu1 }
  0xb7   : > { %v443_v43 = vadd.f32 %v702_v32, %v397_v41  ;;  %v447_v44 = vadd.f32 %v702_v32, %v409_v42 }
  0xb9   : > { %459 = vst [vmem:[%s818_s27 + $0x8] sm:$0xff] %v443_v43 }
  0xba   : > { %463 = vst [vmem:[%s818_s27 + $0x28] sm:$0xff] %v447_v44  ;;  %v421_v45 = vpop.f32.mrf.mxu2  ;;  %v433_v46 = vpop.f32.mrf.mxu3 }
  0xbb   : > { %v451_v47 = vadd.f32 %v702_v32, %v421_v45  ;;  %v455_v48 = vadd.f32 %v702_v32, %v433_v46 }
  0xbd   : > { %467 = vst [vmem:[%s818_s27 + $0x48] sm:$0xff] %v451_v47 }
  0xbe   : > { %471 = vst [vmem:[%s818_s27 + $0x68] sm:$0xff] %v455_v48  ;;  %v400_v49 = vpop.f32.mrf.mxu0  ;;  %v412_v50 = vpop.f32.mrf.mxu1 }
  0xbf   : > { %v444_v51 = vadd.f32 %v702_v32, %v400_v49  ;;  %v448_v52 = vadd.f32 %v702_v32, %v412_v50 }
  0xc1   : > { %460 = vst [vmem:[%s818_s27 + $0x10] sm:$0xff] %v444_v51 }
  0xc2   : > { %464 = vst [vmem:[%s818_s27 + $0x30] sm:$0xff] %v448_v52  ;;  %v424_v53 = vpop.f32.mrf.mxu2  ;;  %v436_v54 = vpop.f32.mrf.mxu3 }
  0xc3   : > { %v452_v55 = vadd.f32 %v702_v32, %v424_v53  ;;  %v456_v56 = vadd.f32 %v702_v32, %v436_v54 }
  0xc5   : > { %468 = vst [vmem:[%s818_s27 + $0x50] sm:$0xff] %v452_v55 }
  0xc6   : > { %472 = vst [vmem:[%s818_s27 + $0x70] sm:$0xff] %v456_v56  ;;  %v403_v57 = vpop.f32.mrf.mxu0  ;;  %v415_v58 = vpop.f32.mrf.mxu1 }
  0xc7   : > { %v445_v59 = vadd.f32 %v702_v32, %v403_v57  ;;  %v449_v60 = vadd.f32 %v702_v32, %v415_v58 }
  0xc9   : > { %461 = vst [vmem:[%s818_s27 + $0x18] sm:$0xff] %v445_v59 }
  0xca   : > { %465 = vst [vmem:[%s818_s27 + $0x38] sm:$0xff] %v449_v60  ;;  %v427_v61 = vpop.f32.mrf.mxu2  ;;  %v439_v62 = vpop.f32.mrf.mxu3 }
  0xcb   : > { %v453_v63 = vadd.f32 %v702_v32, %v427_v61  ;;  %v457_v0 = vadd.f32 %v702_v32, %v439_v62 }
  0xcd   : > { %469 = vst [vmem:[%s818_s27 + $0x58] sm:$0xff] %v453_v63 }
  0xce   : > { %473 = vst [vmem:[%s818_s27 + $0x78] sm:$0xff] %v457_v0 }
  0xcf PF: > { %s13_s14 = sadd.s32 1, %s725_s14   ;;  %s849_s12 = smov %s721_s13 }
  0xd0   : > { %p10_p5 = scmp.ge.s32.totalorder %s13_s14, 4   ;;  %s850_s13 = smov %s852_s15 }
  0xd2   :  { %12 = sbr.rel (!%p10_p5) target bundleno = 2 (0x2), region = 72 }

</bundles_post_ra>
